<compile_context>
chip_gen: v6e
topology: v6e:2x2x1
jax: 0.10.0
libtpu: 0.0.40
codegen_flags: <defaults>
</compile_context>

<pallas_src>
import jax
import jax.numpy as jnp
from jax.experimental import pallas as pl
from jax.experimental.pallas import tpu as pltpu

IN_FEATURES = 28 * 28    # 784
K_PAD = 896              # 7 * 128 (aligned K for first matmul)
HIDDEN = 256
OUT_FEATURES = 100
OUT_PAD = 128            # lane-dense output width


def mlp_kernel(x_ref, w1_ref, b1_ref, w2_ref, b2_ref, o_ref):
    # Linear 1: (TILE_B, 896)bf16 @ (896, 256)bf16 -> f32 accumulation on MXU
    h = jnp.dot(x_ref[...], w1_ref[...], preferred_element_type=jnp.float32)
    # bias + ReLU in f32 on the VPU (v5e has no bf16 VPU)
    h = jnp.maximum(h + b1_ref[...], 0.0)
    # Linear 2: (TILE_B, 256)bf16 @ (256, 128)bf16 -> f32 accumulation
    o = jnp.dot(h.astype(jnp.bfloat16), w2_ref[...],
                preferred_element_type=jnp.float32)
    # bias add + store in f32, lane-dense (128 columns)
    o_ref[...] = (o + b2_ref[...]).astype(o_ref.dtype)


def neural_network_forward(x, w1, b1, w2, b2, *, tile_b=512):
    """x: (B, 1, 28, 28) float32 (NCHW). w1: (784,256), b1: (1,256),
    w2: (256,100), b2: (1,100). Returns logits (B, 100) float32."""
    B = x.shape[0]

    # Flatten exactly like nn.Flatten on NCHW, then pad K: 784 -> 896.
    x2 = x.reshape(B, -1).astype(jnp.float32)
    x2 = jnp.pad(x2, ((0, 0), (0, K_PAD - IN_FEATURES)))

    # Pick a batch tile: 512 (multiple of 256, comfortably within v7x's 64 MiB
    # VMEM at bf16) for large batches, else round the tiny batch up to 8.
    if B >= tile_b:
        TILE_B = tile_b
    else:
        TILE_B = max(8, ((B + 7) // 8) * 8)
    Bp = ((B + TILE_B - 1) // TILE_B) * TILE_B
    if Bp != B:
        x2 = jnp.pad(x2, ((0, Bp - B), (0, 0)))

    # bf16 streaming of x and weights; biases stay f32 for the epilogue.
    x_bf = x2.astype(jnp.bfloat16)
    w1p = jnp.pad(w1.astype(jnp.float32),
                  ((0, K_PAD - IN_FEATURES), (0, 0))).astype(jnp.bfloat16)
    w2p = jnp.pad(w2.astype(jnp.float32),
                  ((0, 0), (0, OUT_PAD - OUT_FEATURES))).astype(jnp.bfloat16)
    b1p = b1.astype(jnp.float32).reshape(1, HIDDEN)
    b2p = jnp.pad(b2.astype(jnp.float32).reshape(1, OUT_FEATURES),
                  ((0, 0), (0, OUT_PAD - OUT_FEATURES)))

    out = pl.pallas_call(
        mlp_kernel,
        out_shape=jax.ShapeDtypeStruct((Bp, OUT_PAD), jnp.float32),
        grid=(Bp // TILE_B,),
        in_specs=[
            # x tiles stream over the batch axis; weights/biases are constant
            # blocks so they remain VMEM-resident across grid steps.
            pl.BlockSpec((TILE_B, K_PAD), lambda i: (i, 0)),
            pl.BlockSpec((K_PAD, HIDDEN), lambda i: (0, 0)),
            pl.BlockSpec((1, HIDDEN), lambda i: (0, 0)),
            pl.BlockSpec((HIDDEN, OUT_PAD), lambda i: (0, 0)),
            pl.BlockSpec((1, OUT_PAD), lambda i: (0, 0)),
        ],
        out_specs=pl.BlockSpec((TILE_B, OUT_PAD), lambda i: (i, 0)),
        compiler_params=pltpu.CompilerParams(
            dimension_semantics=("parallel",),  # shard batch tiles across TCs (v7x)
        ),
    )(x_bf, w1p, b1p, w2p, b2p)

    # Strip batch padding and the lane padding (100 real logits).
    return out[:B, :OUT_FEATURES]


def init_params(key):
    """Deterministic init mirroring torch.nn.Linear default (uniform +/- 1/sqrt(fan_in)).
    Weights stored transposed as (in, out) = PyTorch weight.T."""
    k1, k2, k3, k4 = jax.random.split(key, 4)
    bound1 = 1.0 / jnp.sqrt(IN_FEATURES)
    bound2 = 1.0 / jnp.sqrt(HIDDEN)
    w1 = jax.random.uniform(k1, (IN_FEATURES, HIDDEN), jnp.float32, -bound1, bound1)
    b1 = jax.random.uniform(k2, (1, HIDDEN), jnp.float32, -bound1, bound1)
    w2 = jax.random.uniform(k3, (HIDDEN, OUT_FEATURES), jnp.float32, -bound2, bound2)
    b2 = jax.random.uniform(k4, (1, OUT_FEATURES), jnp.float32, -bound2, bound2)
    return w1, b1, w2, b2


if __name__ == "__main__":
    key = jax.random.PRNGKey(0)
    k_x, k_p = jax.random.split(key)

    B = 8
    x = jax.random.normal(k_x, (B, 1, 28, 28), jnp.float32)  # NCHW, MNIST-like
    w1, b1, w2, b2 = init_params(k_p)

    out = neural_network_forward(x, w1, b1, w2, b2)
    out = jax.block_until_ready(out)

    # Reference in plain JAX, mimicking the bf16 inputs / f32 accumulation.
    x2 = x.reshape(B, -1)
    h_ref = jnp.dot(x2.astype(jnp.bfloat16), w1.astype(jnp.bfloat16),
                    preferred_element_type=jnp.float32) + b1
    h_ref = jnp.maximum(h_ref, 0.0)
    ref = jnp.dot(h_ref.astype(jnp.bfloat16), w2.astype(jnp.bfloat16),
                  preferred_element_type=jnp.float32) + b2

    assert out.shape == (B, OUT_FEATURES)
    assert jnp.allclose(out, ref, atol=2e-2, rtol=2e-2), (
        float(jnp.max(jnp.abs(out - ref))))

    print("KERNEL_OK")
</pallas_src>

<mosaic_0001>
module attributes {stable_mosaic.version = 11 : i64} {
  func.func @mlp_kernel(%arg0: i32, %arg1: memref<8x896xbf16, #tpu.memory_space<vmem>>, %arg2: memref<896x256xbf16, #tpu.memory_space<vmem>>, %arg3: memref<1x256xf32, #tpu.memory_space<vmem>>, %arg4: memref<256x128xbf16, #tpu.memory_space<vmem>>, %arg5: memref<1x128xf32, #tpu.memory_space<vmem>>, %arg6: memref<8x128xf32, #tpu.memory_space<vmem>>) attributes {dimension_semantics = [#tpu.dimension_semantics<parallel>], iteration_bounds = array<i64: 1>, scalar_prefetch = 0 : i64, scratch_operands = 0 : i64, tpu.core_type = #tpu.core_type<tc>, window_params = [{transform_indices = @transform_0, window_bounds = array<i64: 8, 896>}, {pipeline_mode = #tpu.pipeline_mode<synchronous>, transform_indices = @transform_1, window_bounds = array<i64: 896, 256>}, {pipeline_mode = #tpu.pipeline_mode<synchronous>, transform_indices = @transform_2, window_bounds = array<i64: 1, 256>}, {pipeline_mode = #tpu.pipeline_mode<synchronous>, transform_indices = @transform_3, window_bounds = array<i64: 256, 128>}, {pipeline_mode = #tpu.pipeline_mode<synchronous>, transform_indices = @transform_4, window_bounds = array<i64: 1, 128>}, {transform_indices = @transform_5, window_bounds = array<i64: 8, 128>}]} {
    %c0 = arith.constant 0 : index
    %c0_0 = arith.constant 0 : index
    %0 = vector.load %arg1[%c0, %c0_0] : memref<8x896xbf16, #tpu.memory_space<vmem>>, vector<8x896xbf16>
    %c0_1 = arith.constant 0 : index
    %c0_2 = arith.constant 0 : index
    %1 = vector.load %arg2[%c0_1, %c0_2] : memref<896x256xbf16, #tpu.memory_space<vmem>>, vector<896x256xbf16>
    %cst = arith.constant dense<0.000000e+00> : vector<8x256xf32>
    %2 = tpu.matmul %0, %1, %cst {dimension_numbers = #tpu.dot_dimension_numbers<[1], [0], [0], [1], [0, 0, 1, 1], [], []>} : vector<8x896xbf16>, vector<896x256xbf16>, vector<8x256xf32> -> vector<8x256xf32>
    %c0_3 = arith.constant 0 : index
    %c0_4 = arith.constant 0 : index
    %3 = vector.load %arg3[%c0_3, %c0_4] : memref<1x256xf32, #tpu.memory_space<vmem>>, vector<1x256xf32>
    %4 = vector.broadcast %3 : vector<1x256xf32> to vector<8x256xf32>
    %5 = arith.addf %2, %4 : vector<8x256xf32>
    %cst_5 = arith.constant 0.000000e+00 : f32
    %6 = vector.broadcast %cst_5 : f32 to vector<8x256xf32>
    %7 = arith.maximumf %5, %6 : vector<8x256xf32>
    %8 = arith.truncf %7 : vector<8x256xf32> to vector<8x256xbf16>
    %c0_6 = arith.constant 0 : index
    %c0_7 = arith.constant 0 : index
    %9 = vector.load %arg4[%c0_6, %c0_7] : memref<256x128xbf16, #tpu.memory_space<vmem>>, vector<256x128xbf16>
    %cst_8 = arith.constant dense<0.000000e+00> : vector<8x128xf32>
    %10 = tpu.matmul %8, %9, %cst_8 {dimension_numbers = #tpu.dot_dimension_numbers<[1], [0], [0], [1], [0, 0, 1, 1], [], []>} : vector<8x256xbf16>, vector<256x128xbf16>, vector<8x128xf32> -> vector<8x128xf32>
    %c0_9 = arith.constant 0 : index
    %c0_10 = arith.constant 0 : index
    %11 = vector.load %arg5[%c0_9, %c0_10] : memref<1x128xf32, #tpu.memory_space<vmem>>, vector<1x128xf32>
    %12 = vector.broadcast %11 : vector<1x128xf32> to vector<8x128xf32>
    %13 = arith.addf %10, %12 : vector<8x128xf32>
    %c0_11 = arith.constant 0 : index
    %c0_12 = arith.constant 0 : index
    %14 = vector.load %arg6[%c0_11, %c0_12] : memref<8x128xf32, #tpu.memory_space<vmem>>, vector<8x128xf32>
    tpu.vector_store %arg6[%c0_11, %c0_12], %13 {strides = array<i32>} : memref<8x128xf32, #tpu.memory_space<vmem>>, vector<8x128xf32>,
    return
  }
  func.func @transform_0(%arg0: i32) -> (i32, i32) {
    %c0_i32 = arith.constant 0 : i32
    %c0_i32_0 = arith.constant 0 : i32
    return %arg0, %c0_i32 : i32, i32
  }
  func.func @transform_1(%arg0: i32) -> (i32, i32) {
    %c0_i32 = arith.constant 0 : i32
    %c0_i32_0 = arith.constant 0 : i32
    %c0_i32_1 = arith.constant 0 : i32
    return %c0_i32, %c0_i32_0 : i32, i32
  }
  func.func @transform_2(%arg0: i32) -> (i32, i32) {
    %c0_i32 = arith.constant 0 : i32
    %c0_i32_0 = arith.constant 0 : i32
    %c0_i32_1 = arith.constant 0 : i32
    return %c0_i32, %c0_i32_0 : i32, i32
  }
  func.func @transform_3(%arg0: i32) -> (i32, i32) {
    %c0_i32 = arith.constant 0 : i32
    %c0_i32_0 = arith.constant 0 : i32
    %c0_i32_1 = arith.constant 0 : i32
    return %c0_i32, %c0_i32_0 : i32, i32
  }
  func.func @transform_4(%arg0: i32) -> (i32, i32) {
    %c0_i32 = arith.constant 0 : i32
    %c0_i32_0 = arith.constant 0 : i32
    %c0_i32_1 = arith.constant 0 : i32
    return %c0_i32, %c0_i32_0 : i32, i32
  }
  func.func @transform_5(%arg0: i32) -> (i32, i32) {
    %c0_i32 = arith.constant 0 : i32
    %c0_i32_0 = arith.constant 0 : i32
    return %arg0, %c0_i32 : i32, i32
  }
}

</mosaic_0001>

<bundles_post_ra>
// kernel: tpu_custom_call.1
= control target key start
LH: loop header
LB: loop body
LE: loop exit
PB: predicated region body
PF: predicated region fallthrough
CT: control target
= control target key end

     0   :  { %10 = vsyncpa [#allocation3], 0  ;;  %s1641_s0 = inlined_call_operand.hbm [shape: bf16[8,896], index: 0, kind: input, shape index: {}]   ;;  %s1642_s1 = inlined_call_operand.hbm [shape: bf16[896,256], index: 1, kind: input, shape index: {}]   ;;  %s1643_s2 = inlined_call_operand.vmem [shape: f32[1,256], index: 2, kind: input, shape index: {}]   ;;  %s1644_s3 = inlined_call_operand.hbm [shape: bf16[256,128], index: 3, kind: input, shape index: {}]   ;;  %s1645_s4 = inlined_call_operand.vmem [shape: f32[1,128], index: 4, kind: input, shape index: {}]   ;;  %s1646_s5 = inlined_call_operand.hbm [shape: f32[8,128], index: 5, kind: output, shape index: {}]  }
   0x1   :  { %11 = vsyncpa [#allocation6], 0 }
   0x2   :  { %12 = vsyncpa [#allocation4], 0  ;;  %s1578_s18 = smov [#allocation5]  }
   0x3   :  { %s28_s19 = sshll.u32 %s1578_s18, 4  ;;  %s29_s19 = int_to_ptr.vmem [resolvable:$true] %s28_s19 }
   0x4   :  { %s1500_s20 = scalar_lea.vmem %s29_s19, 14336  ;;  %p1505_p1 = scmp.lt.s32.totalorder %s29_s19, %s29_s19 }
   0x5   :  { %p1501_p0 = scmp.ne.s32.totalorder %s29_s19, %s1500_s20  ;;  %p1506_p2 = scmp.lt.s32.totalorder %s1500_s20, %s1500_s20 }
   0x7   :  { %p1507_p3 = por %p1506_p2, %p1505_p1 }
   0x9   :  { %p1508_p4 = pnand %p1507_p3, %p1501_p0 }
   0xb   :  { %1511 = shalt.err (!%p1508_p4)
}
   0xc   :  { %s1579_s21 = smov 128   ;;  %s1580_s22 = smov 8  }
   0xd   :  { %34 = dma.hbm_to_vmem [thread:$0]  %s1642_s1, 14336, %s29_s19, [#allocation6], %s1579_s21, %s1579_s21, %s1580_s22  }
   0xe   :  { %s1581_s25 = smov [#allocation2]   ;;  %s1582_s27 = smov [#allocation7]  }
   0xf   :  { %s19_s26 = sshll.u32 %s1581_s25, 4  ;;  %s42_s28 = sshll.u32 %s1582_s27, 4  ;;  %s20_s26 = int_to_ptr.vmem [resolvable:$true] %s19_s26  ;;  %s43_s28 = int_to_ptr.vmem [resolvable:$true] %s42_s28 }
  0x10   :  { %s1520_s29 = scalar_lea.vmem %s20_s26, 448  ;;  %p1525_p6 = scmp.lt.s32.totalorder %s20_s26, %s20_s26 }
  0x11   :  { %p1521_p5 = scmp.ne.s32.totalorder %s20_s26, %s1520_s29  ;;  %p1526_p7 = scmp.lt.s32.totalorder %s1520_s29, %s1520_s29 }
  0x13   :  { %p1527_p8 = por %p1526_p7, %p1525_p6 }
  0x15   :  { %p1528_p9 = pnand %p1527_p8, %p1521_p5 }
  0x17   :  { %1531 = shalt.err (!%p1528_p9)
}
  0x18   :  { %22 = dma.hbm_to_vmem [thread:$0]  %s1641_s0, 448, %s20_s26, [#allocation3]  }
  0x19   :  { %s1540_s7 = scalar_lea.vmem %s43_s28, 2048  ;;  %p1545_p11 = scmp.lt.s32.totalorder %s43_s28, %s43_s28 }
  0x1a   :  { %p1541_p10 = scmp.ne.s32.totalorder %s43_s28, %s1540_s7  ;;  %p1546_p12 = scmp.lt.s32.totalorder %s1540_s7, %s1540_s7 }
  0x1c   :  { %p1547_p13 = por %p1546_p12, %p1545_p11 }
  0x1e   :  { %p1548_p0 = pnand %p1547_p13, %p1541_p10 }
  0x20   :  { %1551 = shalt.err (!%p1548_p0)
}
  0x21   :  { %s1583_s1 = smov 64   ;;  %s1584_s8 = smov 4  }
  0x22   :  { %48 = dma.hbm_to_vmem [thread:$0]  %s1644_s3, 2048, %s43_s28, [#allocation6], %s1583_s1, %s1583_s1, %s1584_s8  }
  0x23   :  { %1572 = dma.done.wait [#allocation3], 448  }
  0x24   :  { %1573 = vsyncadd [#allocation3], 4294966848 }
  0x25   :  { %1574 = dma.done.wait [#allocation6], 16384  }
  0x26   :  { %1575 = vsyncadd [#allocation6], 4294950912  ;;  %v1301_v0 = vld [vmem:[#allocation5 + $0x74] ss:$8 sps:$4 sm:$0xff]   ;;  %v1303_v1 = vld [vmem:[#allocation5 + $0x70] ss:$8 sps:$4 sm:$0xff]  }
  0x27   :  { %774 = vmatprep.subr.bf16.mxu0 %v1301_v0  ;;  %v1304_v2 = vld [vmem:[#allocation5 + $0x174] ss:$8 sps:$4 sm:$0xff]   ;;  %v1306_v3 = vld [vmem:[#allocation5 + $0x170] ss:$8 sps:$4 sm:$0xff]   ;;  %v1307_v4 = vld [vmem:[#allocation5 + $0x64] ss:$8 sps:$4 sm:$0xff]  }
  0x28   :  { %775 = vmatpush1.bf16.msra.mxu0 %v1303_v1  ;;  %v1309_v5 = vld [vmem:[#allocation5 + $0x60] ss:$8 sps:$4 sm:$0xff]   ;;  %815 = vmatprep.subr.bf16.mxu1 %v1304_v2  ;;  %v1310_v6 = vld [vmem:[#allocation5 + $0x164] ss:$8 sps:$4 sm:$0xff]   ;;  %v1313_v8 = vld [vmem:[#allocation5 + $0x54] ss:$8 sps:$4 sm:$0xff]  }
  0x29   :  { %816 = vmatpush1.bf16.msra.mxu1 %v1306_v3  ;;  %776 = vmatprep.subr.bf16.mxu0 %v1307_v4  ;;  %v1312_v7 = vld [vmem:[#allocation5 + $0x160] ss:$8 sps:$4 sm:$0xff]   ;;  %v1315_v9 = vld [vmem:[#allocation5 + $0x50] ss:$8 sps:$4 sm:$0xff]   ;;  %v1316_v10 = vld [vmem:[#allocation5 + $0x154] ss:$8 sps:$4 sm:$0xff]  }
  0x2a   :  { %817 = vmatprep.subr.bf16.mxu1 %v1310_v6  ;;  %v1319_v11 = vld [vmem:[#allocation5 + $0x44] ss:$8 sps:$4 sm:$0xff]   ;;  %v1318_v12 = vld [vmem:[#allocation5 + $0x150] ss:$8 sps:$4 sm:$0xff]   ;;  %v1321_v14 = vld [vmem:[#allocation5 + $0x40] ss:$8 sps:$4 sm:$0xff]  }
  0x2b   :  { %v1322_v13 = vld [vmem:[#allocation5 + $0x144] ss:$8 sps:$4 sm:$0xff]   ;;  %v1325_v15 = vld [vmem:[#allocation5 + $0x34] ss:$8 sps:$4 sm:$0xff]   ;;  %v1324_v16 = vld [vmem:[#allocation5 + $0x140] ss:$8 sps:$4 sm:$0xff]  }
  0x2c   :  { %777 = vmatpush1.bf16.msra.mxu0 %v1309_v5  ;;  %v1328_v17 = vld [vmem:[#allocation5 + $0x134] ss:$8 sps:$4 sm:$0xff]   ;;  %v1327_v18 = vld [vmem:[#allocation5 + $0x30] ss:$8 sps:$4 sm:$0xff]   ;;  %v1331_v19 = vld [vmem:[#allocation5 + $0x24] ss:$8 sps:$4 sm:$0xff]  }
  0x2d   :  { %778 = vmatprep.subr.bf16.mxu0 %v1313_v8  ;;  %818 = vmatpush1.bf16.msra.mxu1 %v1312_v7  ;;  %v1330_v20 = vld [vmem:[#allocation5 + $0x130] ss:$8 sps:$4 sm:$0xff]   ;;  %v1334_v21 = vld [vmem:[#allocation5 + $0x124] ss:$8 sps:$4 sm:$0xff]   ;;  %v1333_v22 = vld [vmem:[#allocation5 + $0x20] ss:$8 sps:$4 sm:$0xff]  }
  0x2e   :  { %819 = vmatprep.subr.bf16.mxu1 %v1316_v10  ;;  %v1337_v23 = vld [vmem:[#allocation5 + $0x14] ss:$8 sps:$4 sm:$0xff]   ;;  %v1336_v24 = vld [vmem:[#allocation5 + $0x120] ss:$8 sps:$4 sm:$0xff]   ;;  %v1339_v26 = vld [vmem:[#allocation5 + $0x10] ss:$8 sps:$4 sm:$0xff]  }
  0x2f   :  { %v1340_v25 = vld [vmem:[#allocation5 + $0x114] ss:$8 sps:$4 sm:$0xff]   ;;  %v1343_v27 = vld [vmem:[#allocation5 + $0x4] ss:$8 sps:$4 sm:$0xff]   ;;  %v1342_v28 = vld [vmem:[#allocation5 + $0x110] ss:$8 sps:$4 sm:$0xff]  }
  0x30   :  { %779 = vmatpush1.bf16.msra.mxu0 %v1315_v9  ;;  %v1346_v29 = vld [vmem:[#allocation5 + $0x104] ss:$8 sps:$4 sm:$0xff]   ;;  %v1345_v30 = vld [vmem:[#allocation5] ss:$8 sps:$4 sm:$0xff]   ;;  %v1349_v31 = vld [vmem:[#allocation5 + $0xf4] ss:$8 sps:$4 sm:$0xff]  }
  0x31   :  { %780 = vmatprep.subr.bf16.mxu0 %v1319_v11  ;;  %820 = vmatpush1.bf16.msra.mxu1 %v1318_v12  ;;  %v1348_v32 = vld [vmem:[#allocation5 + $0x100] ss:$8 sps:$4 sm:$0xff]   ;;  %v1352_v33 = vld [vmem:[#allocation5 + $0x1f4] ss:$8 sps:$4 sm:$0xff]   ;;  %v1351_v34 = vld [vmem:[#allocation5 + $0xf0] ss:$8 sps:$4 sm:$0xff]  }
  0x32   :  { %821 = vmatprep.subr.bf16.mxu1 %v1322_v13  ;;  %v1355_v35 = vld [vmem:[#allocation5 + $0xe4] ss:$8 sps:$4 sm:$0xff]   ;;  %v1354_v36 = vld [vmem:[#allocation5 + $0x1f0] ss:$8 sps:$4 sm:$0xff]   ;;  %v1357_v38 = vld [vmem:[#allocation5 + $0xe0] ss:$8 sps:$4 sm:$0xff]  }
  0x33   :  { %v1358_v37 = vld [vmem:[#allocation5 + $0x1e4] ss:$8 sps:$4 sm:$0xff]   ;;  %v1361_v39 = vld [vmem:[#allocation5 + $0xd4] ss:$8 sps:$4 sm:$0xff]   ;;  %v1360_v40 = vld [vmem:[#allocation5 + $0x1e0] ss:$8 sps:$4 sm:$0xff]  }
  0x34   :  { %781 = vmatpush1.bf16.msra.mxu0 %v1321_v14  ;;  %v1364_v41 = vld [vmem:[#allocation5 + $0x1d4] ss:$8 sps:$4 sm:$0xff]   ;;  %v1363_v42 = vld [vmem:[#allocation5 + $0xd0] ss:$8 sps:$4 sm:$0xff]   ;;  %v1367_v43 = vld [vmem:[#allocation5 + $0xc4] ss:$8 sps:$4 sm:$0xff]  }
  0x35   :  { %782 = vmatprep.subr.bf16.mxu0 %v1325_v15  ;;  %822 = vmatpush1.bf16.msra.mxu1 %v1324_v16  ;;  %v1366_v44 = vld [vmem:[#allocation5 + $0x1d0] ss:$8 sps:$4 sm:$0xff]   ;;  %v1370_v45 = vld [vmem:[#allocation5 + $0x1c4] ss:$8 sps:$4 sm:$0xff]   ;;  %v1369_v47 = vld [vmem:[#allocation5 + $0xc0] ss:$8 sps:$4 sm:$0xff]  }
  0x36   :  { %823 = vmatprep.subr.bf16.mxu1 %v1328_v17  ;;  %v61_v46 = vld [vmem:[#allocation2] sm:$0xff]  ;;  %v1373_v49 = vld [vmem:[#allocation5 + $0xb4] ss:$8 sps:$4 sm:$0xff]   ;;  %v62_v50 = vld [vmem:[#allocation2 + $0x8] sm:$0xff]  ;;  %v1585_v15 = vmov 0   ;;  %s1586_s12 = smov [#allocation8]  }
  0x37   :  { %v1135_v48 = vcombine.high %v61_v46, %v61_v46  ;;  %v1372_v51 = vld [vmem:[#allocation5 + $0x1c0] ss:$8 sps:$4 sm:$0xff]   ;;  %v1137_v52 = vcombine.high %v62_v50, %v62_v50  ;;  %v1376_v53 = vld [vmem:[#allocation5 + $0x1b4] ss:$8 sps:$4 sm:$0xff]   ;;  %v1375_v54 = vld [vmem:[#allocation5 + $0xb0] ss:$8 sps:$4 sm:$0xff]   ;;  %v1134_v5 = vcombine.low %v61_v46, %v61_v46  ;;  %v1136_v8 = vcombine.low %v62_v50, %v62_v50 }
  0x38   :  { %783 = vmatpush1.bf16.msra.mxu0 %v1327_v18  ;;  %v1379_v55 = vld [vmem:[#allocation5 + $0xa4] ss:$8 sps:$4 sm:$0xff]   ;;  %v1378_v56 = vld [vmem:[#allocation5 + $0x1b0] ss:$8 sps:$4 sm:$0xff]   ;;  %v1381_v58 = vld [vmem:[#allocation5 + $0xa0] ss:$8 sps:$4 sm:$0xff]  }
  0x39   :  { %784 = vmatprep.subr.bf16.mxu0 %v1331_v19  ;;  %824 = vmatpush1.bf16.msra.mxu1 %v1330_v20  ;;  %v1382_v57 = vld [vmem:[#allocation5 + $0x1a4] ss:$8 sps:$4 sm:$0xff]   ;;  %v1385_v59 = vld [vmem:[#allocation5 + $0x94] ss:$8 sps:$4 sm:$0xff]   ;;  %v1384_v60 = vld [vmem:[#allocation5 + $0x1a0] ss:$8 sps:$4 sm:$0xff]  }
  0x3a   :  { %825 = vmatprep.subr.bf16.mxu1 %v1334_v21  ;;  %806 = vmatprep.mubr.bf16.mxu0 %v1135_v48  ;;  %v1388_v61 = vld [vmem:[#allocation5 + $0x194] ss:$8 sps:$4 sm:$0xff]   ;;  %v1387_v62 = vld [vmem:[#allocation5 + $0x90] ss:$8 sps:$4 sm:$0xff]   ;;  %v1391_v63 = vld [vmem:[#allocation5 + $0x84] ss:$8 sps:$4 sm:$0xff]  }
  0x3b   :  { %847 = vmatprep.mubr.bf16.mxu1 %v1137_v52  ;;  %v1390_v0 = vld [vmem:[#allocation5 + $0x190] ss:$8 sps:$4 sm:$0xff]   ;;  %v1394_v1 = vld [vmem:[#allocation5 + $0x184] ss:$8 sps:$4 sm:$0xff]   ;;  %v1393_v2 = vld [vmem:[#allocation5 + $0x80] ss:$8 sps:$4 sm:$0xff]  }
  0x3c   :  { %785 = vmatpush1.bf16.msra.mxu0 %v1333_v22  ;;  %v1401_v3 = vld [vmem:[#allocation5 + $0x274] ss:$8 sps:$4 sm:$0xff]   ;;  %v1398_v4 = vld [vmem:[#allocation5 + $0x180] ss:$8 sps:$4 sm:$0xff]   ;;  %v1399_v7 = vld [vmem:[#allocation5 + $0x270] ss:$8 sps:$4 sm:$0xff]  }
  0x3d   :  { %786 = vmatprep.subr.bf16.mxu0 %v1337_v23  ;;  %826 = vmatpush1.bf16.msra.mxu1 %v1336_v24  ;;  %v1427_v6 = vld [vmem:[#allocation5 + $0x374] ss:$8 sps:$4 sm:$0xff]   ;;  %v1406_v9 = vld [vmem:[#allocation5 + $0x264] ss:$8 sps:$4 sm:$0xff]   ;;  %v1425_v10 = vld [vmem:[#allocation5 + $0x370] ss:$8 sps:$4 sm:$0xff]  }
  0x3e   :  { %827 = vmatprep.subr.bf16.mxu1 %v1340_v25  ;;  %v1433_v11 = vld [vmem:[#allocation5 + $0x364] ss:$8 sps:$4 sm:$0xff]   ;;  %v1404_v12 = vld [vmem:[#allocation5 + $0x260] ss:$8 sps:$4 sm:$0xff]   ;;  %v1409_v13 = vld [vmem:[#allocation5 + $0x254] ss:$8 sps:$4 sm:$0xff]  }
  0x3f   :  { %v1431_v14 = vld [vmem:[#allocation5 + $0x360] ss:$8 sps:$4 sm:$0xff]   ;;  %v1439_v16 = vld [vmem:[#allocation5 + $0x354] ss:$8 sps:$4 sm:$0xff]   ;;  %v1407_v17 = vld [vmem:[#allocation5 + $0x250] ss:$8 sps:$4 sm:$0xff]  }
  0x40   :  { %787 = vmatpush1.bf16.msra.mxu0 %v1339_v26  ;;  %v1412_v18 = vld [vmem:[#allocation5 + $0x244] ss:$8 sps:$4 sm:$0xff]   ;;  %v1410_v19 = vld [vmem:[#allocation5 + $0x240] ss:$8 sps:$4 sm:$0xff]   ;;  %v1437_v20 = vld [vmem:[#allocation5 + $0x350] ss:$8 sps:$4 sm:$0xff]  }
  0x41   :  { %788 = vmatprep.subr.bf16.mxu0 %v1343_v27  ;;  %828 = vmatpush1.bf16.msra.mxu1 %v1342_v28  ;;  %v1445_v21 = vld [vmem:[#allocation5 + $0x344] ss:$8 sps:$4 sm:$0xff]   ;;  %v1415_v22 = vld [vmem:[#allocation5 + $0x234] ss:$8 sps:$4 sm:$0xff]   ;;  %v1443_v23 = vld [vmem:[#allocation5 + $0x340] ss:$8 sps:$4 sm:$0xff]  }
  0x42   :  { %829 = vmatprep.subr.bf16.mxu1 %v1346_v29  ;;  %v1451_v24 = vld [vmem:[#allocation5 + $0x334] ss:$8 sps:$4 sm:$0xff]   ;;  %v1413_v26 = vld [vmem:[#allocation5 + $0x230] ss:$8 sps:$4 sm:$0xff]   ;;  %v1418_v28 = vld [vmem:[#allocation5 + $0x224] ss:$8 sps:$4 sm:$0xff]  }
  0x43   :  { %v1626_v25 = vld [vmem:[#allocation2 + $0x10] sm:$0xff]  ;;  %v1448_v48 = vld [vmem:[#allocation5 + $0x2c4] ss:$8 sps:$4 sm:$0xff]   ;;  %s1124_s13 = sshll.u32 %s1586_s12, 4  ;;  %s1125_s13 = int_to_ptr.vmem [resolvable:$true] %s1124_s13 }
  0x44   :  { %789 = vmatpush1.bf16.msra.mxu0 %v1345_v30  ;;  %v1139_v27 = vcombine.high %v1626_v25, %v1626_v25  ;;  %v1449_v29 = vld [vmem:[#allocation5 + $0x330] ss:$8 sps:$4 sm:$0xff]   ;;  %v1457_v30 = vld [vmem:[#allocation5 + $0x324] ss:$8 sps:$4 sm:$0xff]   ;;  %v1442_v46 = vld [vmem:[#allocation5 + $0x2d4] ss:$8 sps:$4 sm:$0xff]   ;;  %p1557_p2 = scmp.lt.s32.totalorder %s1125_s13, %s1125_s13 }
  0x45   :  { %790 = vmatprep.subr.bf16.mxu0 %v1349_v31  ;;  %830 = vmatpush1.bf16.msra.mxu1 %v1348_v32  ;;  %v1416_v31 = vld [vmem:[#allocation5 + $0x220] ss:$8 sps:$4 sm:$0xff]   ;;  %v1421_v32 = vld [vmem:[#allocation5 + $0x214] ss:$8 sps:$4 sm:$0xff]   ;;  %v1460_v52 = vld [vmem:[#allocation5 + $0x2a4] ss:$8 sps:$4 sm:$0xff]  }
  0x46   :  { %831 = vmatprep.subr.bf16.mxu1 %v1352_v33  ;;  %v1455_v33 = vld [vmem:[#allocation5 + $0x320] ss:$8 sps:$4 sm:$0xff]   ;;  %v1454_v50 = vld [vmem:[#allocation5 + $0x2b4] ss:$8 sps:$4 sm:$0xff]   ;;  %s1552_s14 = scalar_lea.vmem %s1125_s13, 128 }
  0x47   :  { %p1553_p1 = scmp.ne.s32.totalorder %s1125_s13, %s1552_s14  ;;  %p1558_p3 = scmp.lt.s32.totalorder %s1552_s14, %s1552_s14 }
  0x48   :  { %791 = vmatpush2.bf16.msra.mxu0 %v1351_v34  ;;  %v1463_v34 = vld [vmem:[#allocation5 + $0x314] ss:$8 sps:$4 sm:$0xff]  }
  0x49   :  { %792 = vmatprep.subr.bf16.mxu0 %v1355_v35  ;;  %832 = vmatpush2.bf16.msra.mxu1 %v1354_v36  ;;  %v1419_v35 = vld [vmem:[#allocation5 + $0x210] ss:$8 sps:$4 sm:$0xff]   ;;  %v1424_v36 = vld [vmem:[#allocation5 + $0x204] ss:$8 sps:$4 sm:$0xff]   ;;  %p1559_p4 = por %p1558_p3, %p1557_p2 }
  0x4a   :  { %833 = vmatprep.subr.bf16.mxu1 %v1358_v37  ;;  %v1461_v37 = vld [vmem:[#allocation5 + $0x310] ss:$8 sps:$4 sm:$0xff]  }
  0x4b   :  { %p1560_p5 = pnand %p1559_p4, %p1553_p1 }
  0x4c   :  { %793 = vmatpush2.bf16.msra.mxu0 %v1357_v38  ;;  %v1469_v38 = vld [vmem:[#allocation5 + $0x304] ss:$8 sps:$4 sm:$0xff]  }
  0x4d   :  { %794 = vmatprep.subr.bf16.mxu0 %v1361_v39  ;;  %834 = vmatpush2.bf16.msra.mxu1 %v1360_v40  ;;  %v1422_v39 = vld [vmem:[#allocation5 + $0x200] ss:$8 sps:$4 sm:$0xff]   ;;  %v1430_v40 = vld [vmem:[#allocation5 + $0x2f4] ss:$8 sps:$4 sm:$0xff]  }
  0x4e   :  { %835 = vmatprep.subr.bf16.mxu1 %v1364_v41  ;;  %v1467_v41 = vld [vmem:[#allocation5 + $0x300] ss:$8 sps:$4 sm:$0xff]  }
  0x50   :  { %795 = vmatpush2.bf16.msra.mxu0 %v1363_v42  ;;  %v1428_v42 = vld [vmem:[#allocation5 + $0x2f0] ss:$8 sps:$4 sm:$0xff]  }
  0x51   :  { %796 = vmatprep.subr.bf16.mxu0 %v1367_v43  ;;  %836 = vmatpush2.bf16.msra.mxu1 %v1366_v44  ;;  %v1436_v43 = vld [vmem:[#allocation5 + $0x2e4] ss:$8 sps:$4 sm:$0xff]   ;;  %v1473_v44 = vld [vmem:[#allocation2 + $0x18] ss:$0 sps:$4 sm:$0xff]  }
  0x52   :  { %837 = vmatprep.subr.bf16.mxu1 %v1370_v45  ;;  %v1434_v45 = vld [vmem:[#allocation5 + $0x2e0] ss:$8 sps:$4 sm:$0xff]  }
  0x54   :  { %797 = vmatpush2.bf16.msra.mxu0 %v1369_v47  ;;  %v1440_v47 = vld [vmem:[#allocation5 + $0x2d0] ss:$8 sps:$4 sm:$0xff]  }
  0x55   :  { %798 = vmatprep.subr.bf16.mxu0 %v1373_v49  ;;  %838 = vmatpush2.bf16.msra.mxu1 %v1372_v51  ;;  %v1446_v49 = vld [vmem:[#allocation5 + $0x2c0] ss:$8 sps:$4 sm:$0xff]   ;;  %v1452_v51 = vld [vmem:[#allocation5 + $0x2b0] ss:$8 sps:$4 sm:$0xff]  }
  0x56   :  { %839 = vmatprep.subr.bf16.mxu1 %v1376_v53  ;;  %v1458_v53 = vld [vmem:[#allocation5 + $0x2a0] ss:$8 sps:$4 sm:$0xff]  }
  0x58   :  { %799 = vmatpush2.bf16.msra.mxu0 %v1375_v54  ;;  %v1466_v54 = vld [vmem:[#allocation5 + $0x294] ss:$8 sps:$4 sm:$0xff]  }
  0x59   :  { %800 = vmatprep.subr.bf16.mxu0 %v1379_v55  ;;  %840 = vmatpush2.bf16.msra.mxu1 %v1378_v56  ;;  %v1464_v55 = vld [vmem:[#allocation5 + $0x290] ss:$8 sps:$4 sm:$0xff]   ;;  %v1472_v56 = vld [vmem:[#allocation5 + $0x284] ss:$8 sps:$4 sm:$0xff]  }
  0x5a   :  { %841 = vmatprep.subr.bf16.mxu1 %v1382_v57  ;;  %v1470_v57 = vld [vmem:[#allocation5 + $0x280] ss:$8 sps:$4 sm:$0xff]  }
  0x5c   :  { %801 = vmatpush2.bf16.msra.mxu0 %v1381_v58  ;;  %v1138_v58 = vcombine.low %v1626_v25, %v1626_v25 }
  0x5d   :  { %802 = vmatprep.subr.bf16.mxu0 %v1385_v59  ;;  %842 = vmatpush2.bf16.msra.mxu1 %v1384_v60  ;;  %v1476_v59 = vld [vmem:[#allocation7 + $0x78] sm:$0xff]  }
  0x5e   :  { %843 = vmatprep.subr.bf16.mxu1 %v1388_v61  ;;  %v1477_v60 = vld [vmem:[#allocation7 + $0x38] sm:$0xff]   ;;  %v1478_v61 = vld [vmem:[#allocation7 + $0x70] sm:$0xff]  }
  0x60   :  { %803 = vmatpush2.bf16.msra.mxu0 %v1387_v62  ;;  %v1479_v62 = vld [vmem:[#allocation7 + $0x30] sm:$0xff]  }
  0x61   :  { %804 = vmatprep.subr.bf16.mxu0 %v1391_v63  ;;  %844 = vmatpush2.bf16.msra.mxu1 %v1390_v0  ;;  %v1480_v63 = vld [vmem:[#allocation7 + $0x68] sm:$0xff]  }
  0x62   :  { %845 = vmatprep.subr.bf16.mxu1 %v1394_v1  ;;  %v1481_v0 = vld [vmem:[#allocation7 + $0x28] sm:$0xff]   ;;  %v1482_v1 = vld [vmem:[#allocation7 + $0x60] sm:$0xff]  }
  0x64   :  { %805 = vmatpush2.bf16.msra.mxu0 %v1393_v2  ;;  %v1483_v2 = vld [vmem:[#allocation7 + $0x20] sm:$0xff]  }
  0x65   :  { %856 = vmatprep.subr.bf16.mxu0 %v1401_v3  ;;  %846 = vmatpush2.bf16.msra.mxu1 %v1398_v4  ;;  %v1484_v3 = vld [vmem:[#allocation7 + $0x58] sm:$0xff]  }
  0x66   :  { %897 = vmatprep.subr.bf16.mxu1 %v1427_v6  ;;  %v1485_v4 = vld [vmem:[#allocation7 + $0x18] sm:$0xff]   ;;  %v1487_v6 = vld [vmem:[#allocation7 + $0x10] sm:$0xff]  }
  0x67   :  { %807 = vmatmul.mubr.bf16.vlgmr.msra.gmra.mxu0 %v1134_v5  ;;  %v1486_v5 = vld [vmem:[#allocation7 + $0x50] sm:$0xff]  }
  0x68   :  { %857 = vmatpush1.bf16.msra.mxu0 %v1399_v7  ;;  %848 = vmatmul.mubr.bf16.vlgmr.msra.gmra.mxu1 %v1136_v8  ;;  %v1488_v7 = vld [vmem:[#allocation7 + $0x48] sm:$0xff]  }
  0x69   :  { %858 = vmatprep.subr.bf16.mxu0 %v1406_v9  ;;  %898 = vmatpush1.bf16.msra.mxu1 %v1425_v10  ;;  %v1489_v8 = vld [vmem:[#allocation7 + $0x8] sm:$0xff]   ;;  %v1490_v9 = vld [vmem:[#allocation7 + $0x40] sm:$0xff]  }
  0x6a   :  { %929 = vmatprep.mubr.bf16.mxu1 %v1585_v15  ;;  %899 = vmatprep.subr.bf16.mxu1 %v1433_v11  ;;  %v1491_v10 = vld [vmem:[#allocation7] sm:$0xff]  }
  0x6b   :  { %888 = vmatprep.mubr.bf16.mxu0 %v1139_v27 }
  0x6c   :  { %859 = vmatpush1.bf16.msra.mxu0 %v1404_v12 }
  0x6d   :  { %860 = vmatprep.subr.bf16.mxu0 %v1409_v13  ;;  %900 = vmatpush1.bf16.msra.mxu1 %v1431_v14 }
  0x6e   :  { %901 = vmatprep.subr.bf16.mxu1 %v1439_v16 }
  0x70   :  { %861 = vmatpush1.bf16.msra.mxu0 %v1407_v17 }
  0x71   :  { %862 = vmatprep.subr.bf16.mxu0 %v1412_v18  ;;  %902 = vmatpush1.bf16.msra.mxu1 %v1437_v20 }
  0x72   :  { %903 = vmatprep.subr.bf16.mxu1 %v1445_v21 }
  0x74   :  { %863 = vmatpush1.bf16.msra.mxu0 %v1410_v19 }
  0x75   :  { %864 = vmatprep.subr.bf16.mxu0 %v1415_v22  ;;  %904 = vmatpush1.bf16.msra.mxu1 %v1443_v23  ;;  %v179_v23 = vlaneseq }
  0x76   :  { %905 = vmatprep.subr.bf16.mxu1 %v1451_v24 }
  0x77   :  { %v180_v24 = vshrl.u32 %v179_v23, 7 }
  0x78   :  { %865 = vmatpush1.bf16.msra.mxu0 %v1413_v26  ;;  %v177_v26 = vld [vmem:[%s1643_s2] sm:$0x3] }
  0x79   :  { %866 = vmatprep.subr.bf16.mxu0 %v1418_v28  ;;  %906 = vmatpush1.bf16.msra.mxu1 %v1449_v29  ;;  %v181_v25 = vsub.s32 0, %v180_v24  ;;  %v185_v27 = vsub.s32 1, %v180_v24 }
  0x7a   :  { %907 = vmatprep.subr.bf16.mxu1 %v1457_v30 }
  0x7b   :  { %v182_v28 = vrot.slane %v177_v26, %v181_v25  ;;  %v186_v29 = vrot.slane %v177_v26, %v185_v27 }
  0x7c   :  { %867 = vmatpush1.bf16.msra.mxu0 %v1416_v31 }
  0x7d   :  { %868 = vmatprep.subr.bf16.mxu0 %v1421_v32  ;;  %908 = vmatpush1.bf16.msra.mxu1 %v1455_v33 }
  0x7e   :  { %909 = vmatprep.subr.bf16.mxu1 %v1463_v34 }
  0x80   :  { %869 = vmatpush1.bf16.msra.mxu0 %v1419_v35 }
  0x81   :  { %870 = vmatprep.subr.bf16.mxu0 %v1424_v36  ;;  %910 = vmatpush1.bf16.msra.mxu1 %v1461_v37 }
  0x82   :  { %911 = vmatprep.subr.bf16.mxu1 %v1469_v38 }
  0x84   :  { %871 = vmatpush1.bf16.msra.mxu0 %v1422_v39 }
  0x85   :  { %872 = vmatprep.subr.bf16.mxu0 %v1430_v40  ;;  %912 = vmatpush1.bf16.msra.mxu1 %v1467_v41 }
  0x86   :  { %1270 = vmatprep.subr.bf16.mxu1 %v1476_v59 }
  0x88   :  { %873 = vmatpush2.bf16.msra.mxu0 %v1428_v42  ;;  %930 = vmatmul.mubr.bf16.vlgmr.msra.gmra.mxu1 %v1473_v44 }
  0x89   :  { %874 = vmatprep.subr.bf16.mxu0 %v1436_v43  ;;  %1271 = vmatpush3.bf16.msra.mxu1 %v1477_v60 }
  0x8a   :  { %1272 = vmatprep.subr.bf16.mxu1 %v1478_v61 }
  0x8c   :  { %875 = vmatpush2.bf16.msra.mxu0 %v1434_v45 }
  0x8d   :  { %876 = vmatprep.subr.bf16.mxu0 %v1442_v46  ;;  %1273 = vmatpush3.bf16.msra.mxu1 %v1479_v62 }
  0x8e   :  { %1274 = vmatprep.subr.bf16.mxu1 %v1480_v63 }
  0x90   :  { %877 = vmatpush2.bf16.msra.mxu0 %v1440_v47  ;;  %v1253_v47 = vld [vmem:[%s1645_s4] ss:$0 sm:$0xff] }
  0x91   :  { %878 = vmatprep.subr.bf16.mxu0 %v1448_v48  ;;  %1275 = vmatpush3.bf16.msra.mxu1 %v1481_v0 }
  0x92   :  { %1276 = vmatprep.subr.bf16.mxu1 %v1482_v1 }
  0x94   :  { %879 = vmatpush2.bf16.msra.mxu0 %v1446_v49 }
  0x95   :  { %880 = vmatprep.subr.bf16.mxu0 %v1454_v50  ;;  %1277 = vmatpush3.bf16.msra.mxu1 %v1483_v2 }
  0x96   :  { %1278 = vmatprep.subr.bf16.mxu1 %v1484_v3 }
  0x98   :  { %881 = vmatpush2.bf16.msra.mxu0 %v1452_v51 }
  0x99   :  { %882 = vmatprep.subr.bf16.mxu0 %v1460_v52  ;;  %1279 = vmatpush3.bf16.msra.mxu1 %v1485_v4 }
  0x9a   :  { %1280 = vmatprep.subr.bf16.mxu1 %v1486_v5 }
  0x9c   :  { %883 = vmatpush2.bf16.msra.mxu0 %v1458_v53 }
  0x9d   :  { %884 = vmatprep.subr.bf16.mxu0 %v1466_v54  ;;  %1281 = vmatpush3.bf16.msra.mxu1 %v1487_v6 }
  0x9e   :  { %1282 = vmatprep.subr.bf16.mxu1 %v1488_v7 }
  0xa0   :  { %885 = vmatpush2.bf16.msra.mxu0 %v1464_v55 }
  0xa1   :  { %886 = vmatprep.subr.bf16.mxu0 %v1472_v56  ;;  %1283 = vmatpush3.bf16.msra.mxu1 %v1489_v8 }
  0xa2   :  { %1284 = vmatprep.subr.bf16.mxu1 %v1490_v9 }
  0xa4   :  { %887 = vmatpush2.bf16.msra.mxu0 %v1470_v57 }
  0xa5   :  { %1285 = vmatpush3.bf16.msra.mxu1 %v1491_v10 }
  0xa7   :  { %889 = vmatmul.mubr.bf16.vlgmr.msra.gmra.mxu0 %v1138_v58 }
 0x127   :  { %v808_v11 = vpop.f32.mrf.mxu0 }
 0x128   :  { %v849_v13 = vpop.f32.mrf.mxu1  ;;  %v809_v30 = vadd.f32 %v808_v11, %v182_v28 }
 0x129   :  { %v810_v12 = vpop.f32.mrf.mxu0 }
 0x12a   :  { %v851_v15 = vpop.f32.mrf.mxu1  ;;  %v811_v31 = vadd.f32 %v810_v12, %v186_v29  ;;  %v850_v32 = vadd.f32 %v849_v13, %v809_v30 }
 0x12b   :  { %v812_v14 = vpop.f32.mrf.mxu0 }
 0x12c   :  { %v853_v17 = vpop.f32.mrf.mxu1  ;;  %v852_v34 = vadd.f32 %v851_v15, %v811_v31 }
 0x12d   :  { %v813_v16 = vpop.f32.mrf.mxu0 }
 0x12e   :  { %v854_v18 = vpop.f32.mrf.mxu1 }
 0x148   :  { %v931_v19 = vpop.f32.mrf.mxu1 }
 0x14a   :  { %v933_v20 = vpop.f32.mrf.mxu1 }
 0x14c   :  { %v935_v21 = vpop.f32.mrf.mxu1 }
 0x14e   :  { %v936_v22 = vpop.f32.mrf.mxu1 }
 0x167   :  { %v890_v33 = vpop.f32.mrf.mxu0 }
 0x168   :  { %v891_v35 = vadd.f32 %v890_v33, %v850_v32 }
 0x169   :  { %v892_v36 = vpop.f32.mrf.mxu0 }
 0x16a   :  { %v932_v37 = vadd.f32 %v931_v19, %v891_v35  ;;  %v893_v38 = vadd.f32 %v892_v36, %v852_v34 }
 0x16b   :  { %v894_v39 = vpop.f32.mrf.mxu0 }
 0x16c   :  { %v934_v40 = vadd.f32 %v933_v20, %v893_v38  ;;  %v938_v41 = vmax.f32 %v932_v37, 0.0 }
 0x16d   :  { %v895_v42 = vpop.f32.mrf.mxu0 }
 0x16e   :  { %v939_v43 = vmax.f32 %v934_v40, 0.0  ;;  %v940_v45 = vpack.c.bf16 %v938_v41, %v938_v41 }
 0x170   :  { %v941_v44 = vpack.c.bf16 %v939_v43, %v939_v43 }
 0x172   :  { %1109 = vmatprep.mubr.bf16.mxu1 %v941_v44 }
 0x173   :  { %1110 = vmatmul.mubr.bf16.vlgmr.msra.gmra.mxu1 %v940_v45 }
 0x233   :  { %v1286_v46 = vpop.f32.mrf.mxu1 }
 0x235   :  { %v1287_v48 = vpop.f32.mrf.mxu1 }
 0x236   :  { %v1288_v49 = vadd.f32 %v1287_v48, %v1286_v46 }
 0x237   :  { %v1289_v50 = vpop.f32.mrf.mxu1 }
 0x238   :  { %v1112_v51 = vadd.f32 %v1288_v49, %v1253_v47 }
 0x239   :  { %v1290_v52 = vpop.f32.mrf.mxu1 }
 0x23a   :  { %1117 = vst [vmem:[#allocation8] sm:$0xff] %v1112_v51 }
 0x23b   :  { %1563 = shalt.err (!%p1560_p5)
}
 0x23c   :  { %1127 = dma.vmem_to_hbm [thread:$0]  %s1125_s13, 128, %s1646_s5, [#allocation4]  }
 0x23d   :  { %1576 = dma.done.wait [#allocation4], 128  }
 0x23e   :  { %1577 = vsyncadd [#allocation4], 4294967168 }
 0x23f   :  { %1131 = vsyncpa [#allocation3], 1 }
 0x240   :  { %1132 = vsyncpa [#allocation6], 1 }
 0x241   :  { %1133 = vsyncpa [#allocation4], 1 }

</bundles_post_ra>
